<compile_context>
chip_gen: v6e
topology: v6e:2x2x1
jax: 0.10.0
libtpu: 0.0.40
codegen_flags: <defaults>
</compile_context>

<pallas_src>
import jax
import jax.numpy as jnp
from jax import lax
from jax.experimental import pallas as pl
from jax.experimental.pallas import tpu as pltpu


def _cdiv(a, b):
    return -(-a // b)


def _round_up(n, m):
    return _cdiv(n, m) * m


def _choose_tile(dim, cap, align):
    """Pick (tile, padded_dim) for one dimension.

    dim <= cap: use the full dimension as the block (full-extent blocks are
    legal for any size -> no padding, no output slice).
    dim >  cap: split into cdiv(dim, cap) tiles, each rounded up to `align`
    (minimizes padding while keeping lane/sublane alignment).
    """
    if dim <= cap:
        return dim, dim
    n_tiles = _cdiv(dim, cap)
    tile = _round_up(_cdiv(dim, n_tiles), align)
    return tile, n_tiles * tile


def _linear_kernel_single_k(x_ref, w_ref, b_ref, o_ref):
    # K fits in one block: no K grid axis, no accumulator scratch, no RMW traffic.
    acc = lax.dot_general(
        x_ref[...], w_ref[...],
        dimension_numbers=(((1,), (1,)), ((), ())),   # x @ W^T, MXU-native form
        preferred_element_type=jnp.float32)
    o_ref[...] = (acc + b_ref[...]).astype(o_ref.dtype)


def _linear_kernel_multi_k(x_ref, w_ref, b_ref, o_ref, acc_ref):
    # Grid = (M tiles, N tiles, K tiles); K innermost ("arbitrary") reduction axis.
    k = pl.program_id(2)

    @pl.when(k == 0)
    def _():
        acc_ref[...] = jnp.zeros_like(acc_ref)

    acc_ref[...] += lax.dot_general(
        x_ref[...], w_ref[...],
        dimension_numbers=(((1,), (1,)), ((), ())),   # transposed-RHS, MXU-native
        preferred_element_type=jnp.float32)

    @pl.when(k == pl.num_programs(2) - 1)
    def _():
        # Bias added exactly once, in the K epilogue (correct under K splitting).
        o_ref[...] = (acc_ref[...] + b_ref[...]).astype(o_ref.dtype)


# Tile caps (elements). Max f32 footprint (tm=tn=512, tk=2048, double-buffered
# x/w/out + f32 acc) is ~20 MiB -> fits comfortably on every generation
# (v7x: 64 MiB physical / 32 MiB scoped default; v5e/v6e: 128 MiB physical).
_TM_CAP = 512
_TN_CAP = 512
_TK_CAP = 2048


def pallas_linear(x, weight, bias, *, compute_dtype=None):
    """out = x @ weight.T + bias  (torch.nn.Linear forward).

    x: (B, in_dim); weight: (out_dim, in_dim) PyTorch layout; bias: (out_dim,).
    compute_dtype: optional operand cast (e.g. jnp.bfloat16) for the MXU /
    halved weight HBM traffic; accumulation stays f32, output keeps x.dtype.
    """
    B, K = x.shape
    N, K_w = weight.shape
    assert K == K_w and bias.shape == (N,)
    out_dtype = x.dtype

    if compute_dtype is not None:
        x = x.astype(compute_dtype)
        weight = weight.astype(compute_dtype)

    tm, B_pad = _choose_tile(B, _TM_CAP, 8)     # sublane-aligned (or full dim)
    tn, N_pad = _choose_tile(N, _TN_CAP, 128)   # lane-aligned (or full dim)
    tk, K_pad = _choose_tile(K, _TK_CAP, 128)   # lane-aligned (or full dim)

    def _maybe_pad(a, target_shape):
        pads = [(0, t - s) for s, t in zip(a.shape, target_shape)]
        if any(p for _, p in pads):
            return jnp.pad(a, pads)
        return a

    x_p = _maybe_pad(x, (B_pad, K_pad))
    w_p = _maybe_pad(weight, (N_pad, K_pad))                        # stays (out, in)
    b_p = _maybe_pad(bias.astype(jnp.float32).reshape(1, N), (1, N_pad))

    gm, gn, gk = B_pad // tm, N_pad // tn, K_pad // tk
    in_itemsize = jnp.dtype(x_p.dtype).itemsize
    out_itemsize = jnp.dtype(out_dtype).itemsize

    # Real streamed HBM traffic: W is read once per M tile, x once per N tile.
    cost = pl.CostEstimate(
        flops=2 * B_pad * N_pad * K_pad,
        transcendentals=0,
        bytes_accessed=(gn * B_pad * K_pad * in_itemsize       # x reads
                        + gm * N_pad * K_pad * in_itemsize     # weight reads
                        + gm * N_pad * 4                       # bias reads
                        + B_pad * N_pad * out_itemsize))       # out writes

    # Explicit VMEM budget from the actual double-buffered footprint, with 1.5x
    # headroom; clamp to [32 MiB, 48 MiB] (48 MiB < v7x's 64 MiB physical).
    vmem_est = (2 * (tm * tk + tn * tk) * in_itemsize
                + 2 * tm * tn * out_itemsize
                + 2 * tn * 4
                + (tm * tn * 4 if gk > 1 else 0))
    vmem_limit = min(48 << 20, max(32 << 20, (vmem_est * 3) // 2))

    if gk == 1:
        kernel = _linear_kernel_single_k
        grid_spec = pltpu.PrefetchScalarGridSpec(
            num_scalar_prefetch=0,
            grid=(gm, gn),
            in_specs=[
                pl.BlockSpec((tm, tk), lambda i, j: (i, 0)),   # x
                pl.BlockSpec((tn, tk), lambda i, j: (j, 0)),   # weight (out, in)
                pl.BlockSpec((1, tn), lambda i, j: (0, j)),    # bias
            ],
            out_specs=pl.BlockSpec((tm, tn), lambda i, j: (i, j)),
        )
        dims = ("parallel", "parallel")
    else:
        kernel = _linear_kernel_multi_k
        grid_spec = pltpu.PrefetchScalarGridSpec(
            num_scalar_prefetch=0,
            grid=(gm, gn, gk),
            in_specs=[
                pl.BlockSpec((tm, tk), lambda i, j, k: (i, k)),   # x
                pl.BlockSpec((tn, tk), lambda i, j, k: (j, k)),   # weight (out, in)
                pl.BlockSpec((1, tn), lambda i, j, k: (0, j)),    # bias
            ],
            out_specs=pl.BlockSpec((tm, tn), lambda i, j, k: (i, j)),
            scratch_shapes=[pltpu.VMEM((tm, tn), jnp.float32)],
        )
        dims = ("parallel", "parallel", "arbitrary")

    out = pl.pallas_call(
        kernel,
        out_shape=jax.ShapeDtypeStruct((B_pad, N_pad), out_dtype),
        grid_spec=grid_spec,
        compiler_params=pltpu.CompilerParams(
            dimension_semantics=dims,
            vmem_limit_bytes=vmem_limit),
        cost_estimate=cost,
    )(x_p, w_p, b_p)

    if (B_pad, N_pad) != (B, N):
        out = out[:B, :N]
    return out


if __name__ == "__main__":
    key = jax.random.PRNGKey(0)
    k_x, k_w, k_b, k_x2, k_w2, k_b2 = jax.random.split(key, 6)

    linear = jax.jit(pallas_linear)

    # Case 1: tiny LR-model shapes (single-K kernel, pad-free full-extent blocks,
    # grid (1,1), no output slice).
    B, IN, OUT = 8, 32, 16
    x = jax.random.normal(k_x, (B, IN), dtype=jnp.float32)
    weight = jax.random.normal(k_w, (OUT, IN), dtype=jnp.float32) * (1.0 / jnp.sqrt(IN))
    bias = jax.random.normal(k_b, (OUT,), dtype=jnp.float32) * 0.1

    out = jax.block_until_ready(linear(x, weight, bias))
    ref = x @ weight.T + bias
    assert out.shape == (B, OUT)
    assert jnp.allclose(out, ref, atol=2e-2, rtol=2e-2)

    # Case 2: multi-tile path (2 M tiles with M padding, 2 K tiles -> f32 acc
    # kernel, single N tile).
    B2, IN2, OUT2 = 600, 2304, 384
    x2 = jax.random.normal(k_x2, (B2, IN2), dtype=jnp.float32)
    w2 = jax.random.normal(k_w2, (OUT2, IN2), dtype=jnp.float32) * (1.0 / jnp.sqrt(IN2))
    b2 = jax.random.normal(k_b2, (OUT2,), dtype=jnp.float32) * 0.1

    out2 = jax.block_until_ready(linear(x2, w2, b2))
    ref2 = x2 @ w2.T + b2
    assert out2.shape == (B2, OUT2)
    assert jnp.allclose(out2, ref2, atol=2e-2, rtol=2e-2)

    print("KERNEL_OK")
</pallas_src>

<mosaic_0001>
module attributes {stable_mosaic.version = 11 : i64} {
  func.func @_linear_kernel_single_k(%arg0: i32, %arg1: i32, %arg2: memref<8x32xf32, #tpu.memory_space<vmem>>, %arg3: memref<16x32xf32, #tpu.memory_space<vmem>>, %arg4: memref<1x16xf32, #tpu.memory_space<vmem>>, %arg5: memref<8x16xf32, #tpu.memory_space<vmem>>) attributes {dimension_semantics = [#tpu.dimension_semantics<parallel>, #tpu.dimension_semantics<parallel>], iteration_bounds = array<i64: 1, 1>, scalar_prefetch = 0 : i64, scratch_operands = 0 : i64, tpu.core_type = #tpu.core_type<tc>, window_params = [{transform_indices = @transform_0, window_bounds = array<i64: 8, 32>}, {transform_indices = @transform_1, window_bounds = array<i64: 16, 32>}, {transform_indices = @transform_2, window_bounds = array<i64: 1, 16>}, {transform_indices = @transform_3, window_bounds = array<i64: 8, 16>}]} {
    %c0 = arith.constant 0 : index
    %c0_0 = arith.constant 0 : index
    %0 = vector.load %arg2[%c0, %c0_0] : memref<8x32xf32, #tpu.memory_space<vmem>>, vector<8x32xf32>
    %c0_1 = arith.constant 0 : index
    %c0_2 = arith.constant 0 : index
    %1 = vector.load %arg3[%c0_1, %c0_2] : memref<16x32xf32, #tpu.memory_space<vmem>>, vector<16x32xf32>
    %cst = arith.constant dense<0.000000e+00> : vector<8x16xf32>
    %2 = tpu.matmul %0, %1, %cst {dimension_numbers = #tpu.dot_dimension_numbers<[1], [1], [0], [0], [0, 0, 1, 0], [], []>} : vector<8x32xf32>, vector<16x32xf32>, vector<8x16xf32> -> vector<8x16xf32>
    %c0_3 = arith.constant 0 : index
    %c0_4 = arith.constant 0 : index
    %3 = vector.load %arg4[%c0_3, %c0_4] : memref<1x16xf32, #tpu.memory_space<vmem>>, vector<1x16xf32>
    %4 = vector.broadcast %3 : vector<1x16xf32> to vector<8x16xf32>
    %5 = arith.addf %2, %4 : vector<8x16xf32>
    %c0_5 = arith.constant 0 : index
    %c0_6 = arith.constant 0 : index
    %6 = vector.load %arg5[%c0_5, %c0_6] : memref<8x16xf32, #tpu.memory_space<vmem>>, vector<8x16xf32>
    tpu.vector_store %arg5[%c0_5, %c0_6], %5 {strides = array<i32>} : memref<8x16xf32, #tpu.memory_space<vmem>>, vector<8x16xf32>,
    return
  }
  func.func @transform_0(%arg0: i32, %arg1: i32) -> (i32, i32) {
    %c0_i32 = arith.constant 0 : i32
    %c0_i32_0 = arith.constant 0 : i32
    return %arg0, %c0_i32 : i32, i32
  }
  func.func @transform_1(%arg0: i32, %arg1: i32) -> (i32, i32) {
    %c0_i32 = arith.constant 0 : i32
    %c0_i32_0 = arith.constant 0 : i32
    return %arg1, %c0_i32 : i32, i32
  }
  func.func @transform_2(%arg0: i32, %arg1: i32) -> (i32, i32) {
    %c0_i32 = arith.constant 0 : i32
    %c0_i32_0 = arith.constant 0 : i32
    return %c0_i32, %arg1 : i32, i32
  }
  func.func @transform_3(%arg0: i32, %arg1: i32) -> (i32, i32) {
    %c0_i32 = arith.constant 0 : i32
    return %arg0, %arg1 : i32, i32
  }
}

</mosaic_0001>

<bundles_post_ra>
// kernel: pallas_linear.1
= control target key start
LH: loop header
LB: loop body
LE: loop exit
PB: predicated region body
PF: predicated region fallthrough
CT: control target
= control target key end

     0   :  { %8 = vsyncpa [#allocation3], 0  ;;  %s275_s0 = inlined_call_operand.hbm [shape: f32[8,32], index: 0, kind: input, shape index: {}]   ;;  %s276_s1 = inlined_call_operand.hbm [shape: f32[16,32], index: 1, kind: input, shape index: {}]   ;;  %s277_s2 = inlined_call_operand.vmem [shape: f32[1,16], index: 2, kind: input, shape index: {}]   ;;  %s278_s3 = inlined_call_operand.hbm [shape: f32[8,16], index: 3, kind: output, shape index: {}]  }
   0x1   :  { %9 = vsyncpa [#allocation6], 0 }
   0x2   :  { %10 = vsyncpa [#allocation4], 0  ;;  %s236_s12 = smov [#allocation2]   ;;  %s237_s14 = smov [#allocation5]  }
   0x3   :  { %s17_s13 = sshll.u32 %s236_s12, 4  ;;  %s26_s15 = sshll.u32 %s237_s14, 4  ;;  %s18_s13 = int_to_ptr.vmem [resolvable:$true] %s17_s13  ;;  %s27_s15 = int_to_ptr.vmem [resolvable:$true] %s26_s15 }
   0x4   :  { %s178_s16 = scalar_lea.vmem %s18_s13, 128  ;;  %p183_p1 = scmp.lt.s32.totalorder %s18_s13, %s18_s13 }
   0x5   :  { %p179_p0 = scmp.ne.s32.totalorder %s18_s13, %s178_s16  ;;  %p184_p2 = scmp.lt.s32.totalorder %s178_s16, %s178_s16 }
   0x7   :  { %p185_p3 = por %p184_p2, %p183_p1 }
   0x9   :  { %p186_p4 = pnand %p185_p3, %p179_p0 }
   0xb   :  { %189 = shalt.err (!%p186_p4)
}
   0xc   :  { %20 = dma.hbm_to_vmem [thread:$0]  %s275_s0, 128, %s18_s13, [#allocation3]  }
   0xd   :  { %s198_s19 = scalar_lea.vmem %s27_s15, 256  ;;  %p203_p6 = scmp.lt.s32.totalorder %s27_s15, %s27_s15 }
   0xe   :  { %p199_p5 = scmp.ne.s32.totalorder %s27_s15, %s198_s19  ;;  %p204_p7 = scmp.lt.s32.totalorder %s198_s19, %s198_s19 }
  0x10   :  { %p205_p8 = por %p204_p7, %p203_p6 }
  0x12   :  { %p206_p9 = pnand %p205_p8, %p199_p5 }
  0x14   :  { %209 = shalt.err (!%p206_p9)
}
  0x15   :  { %s238_s20 = smov 128   ;;  %s239_s21 = smov 8  }
  0x16   :  { %32 = dma.hbm_to_vmem [thread:$0]  %s276_s1, 256, %s27_s15, [#allocation6], %s238_s20, %s238_s20, %s239_s21  }
  0x17   :  { %230 = dma.done.wait [#allocation3], 128  }
  0x18   :  { %231 = vsyncadd [#allocation3], 4294967168 }
  0x19   :  { %232 = dma.done.wait [#allocation6], 256  }
  0x1a   :  { %233 = vsyncadd [#allocation6], 4294967040  ;;  %v240_v0 = vmov 0.0   ;;  %vm241_vm0 = vmmov 0   ;;  %vm51_vm1 = vcmask 261120   ;;  %v43_v1 = vld [vmem:[#allocation5 + $0x8] sm:$0xff] }
  0x1b   :  { %156 = vmatprep.subr.mxu0 %v240_v0  ;;  %160 = vmatprep.mubr.msk.f32.mxu0 %vm241_vm0, %v240_v0  ;;  %v42_v2 = vld [vmem:[#allocation5] sm:$0xff]  ;;  %v41_v3 = vld [vmem:[#allocation2] sm:$0xff]  ;;  %s242_s1 = smov [#allocation7]   ;;  %vm131_vm2 = vcmask 130048  }
  0x1c   :  { %157 = vmatpush3.xpose.msk.msra.mxu0 %vm51_vm1, %v43_v1  ;;  %v149_v4 = vld [vmem:[%s277_s2] ss:$0 sm:$0xff]  ;;  %s139_s25 = sshll.u32 %s242_s1, 4  ;;  %s140_s25 = int_to_ptr.vmem [resolvable:$true] %s139_s25 }
  0x1d   :  { %158 = vmatprep.subr.mxu0 %v240_v0  ;;  %s210_s26 = scalar_lea.vmem %s140_s25, 128  ;;  %p215_p11 = scmp.lt.s32.totalorder %s140_s25, %s140_s25 }
  0x1e   :  { %p211_p10 = scmp.ne.s32.totalorder %s140_s25, %s210_s26  ;;  %p216_p12 = scmp.lt.s32.totalorder %s210_s26, %s210_s26 }
  0x20   :  { %159 = vmatpush3.xpose.msk.msra.mxu0 %vm51_vm1, %v42_v2  ;;  %p217_p13 = por %p216_p12, %p215_p11 }
  0x22   :  { %p218_p0 = pnand %p217_p13, %p211_p10 }
  0x23   :  { %161 = vmatmul.mubr.msk.f32.vlgmr.msra.gmra.mxu0 %vm51_vm1, %v41_v3 }
  0xe3   :  { %v127_v5 = vpop.f32.mrf.mxu0 }
  0xe4   :  { %v128_v6 = vadd.f32 %v149_v4, %v127_v5 }
  0xe5   :  { %v162_v7 = vpop.f32.mrf.mxu0 }
  0xe6   :  { %132 = vst.msk [vmem:[#allocation7] sm:$0xff] %vm131_vm2, %v128_v6 }
  0xe7   :  { %221 = shalt.err (!%p218_p0)
}
  0xe8   :  { %142 = dma.vmem_to_hbm [thread:$0]  %s140_s25, 128, %s278_s3, [#allocation4]  }
  0xe9   :  { %234 = dma.done.wait [#allocation4], 128  }
  0xea   :  { %235 = vsyncadd [#allocation4], 4294967168 }
  0xeb   :  { %146 = vsyncpa [#allocation3], 1 }
  0xec   :  { %147 = vsyncpa [#allocation6], 1 }
  0xed   :  { %148 = vsyncpa [#allocation4], 1 }

</bundles_post_ra>
